<compile_context>
chip_gen: v5e
topology: v5e:2x2
jax: 0.10.0
libtpu: 0.0.40
codegen_flags: <defaults>
</compile_context>

<pallas_src>
import jax
import jax.numpy as jnp
from jax.experimental import pallas as pl
from jax.experimental.pallas import tpu as pltpu
import numpy as np


_SQRT1_2 = 0.7071067811865476


def _erf_poly(z):
    """Abramowitz & Stegun 7.1.26 erf approximation (|abs err| <= 1.5e-7).

    Built only from VPU ops + one EUP exp so it lowers on v5e/v6e/v7x.
    """
    a1 = 0.254829592
    a2 = -0.284496736
    a3 = 1.421413741
    a4 = -1.453152027
    a5 = 1.061405429
    p = 0.3275911
    az = jnp.abs(z)
    t = 1.0 / (1.0 + p * az)
    poly = ((((a5 * t + a4) * t + a3) * t + a2) * t + a1) * t
    y = 1.0 - poly * jnp.exp(-az * az)
    return jnp.where(z < 0, -y, y)


def _gelu_exactish(z):
    """GELU(x) = 0.5 x (1 + erf(x/sqrt(2))) -- matches nn.GELU() to ~1e-7."""
    return 0.5 * z * (1.0 + _erf_poly(z * _SQRT1_2))


def sero_kernel(x_ref, we_ref, be_ref, wa_ref, ba_ref, out_ref, att_ref):
    # x_ref: (BB, C, Np); we_ref: (C, H) [mean & BN folded]; be_ref: (1, H);
    # wa_ref: (H, C); ba_ref: (1, C); out_ref: (BB, C, Np); att_ref: (BB, 1, C).

    # Squeeze: lane-reduce over the node axis (XLU).  1/N of the mean (and the
    # eval BatchNorm affine) are pre-folded into we_ref/be_ref, so a plain sum
    # suffices.  Reduce straight out of the ref so the big tile isn't held
    # live across the matmul / GELU section.
    s = jnp.sum(x_ref[...].astype(jnp.float32), axis=-1)          # (BB, C)

    # Embed Linear + (folded) BatchNorm, then GELU.  One MXU call for all rows.
    e = jnp.dot(s, we_ref[...], preferred_element_type=jnp.float32) + be_ref[...]
    e = _gelu_exactish(e)                                          # (BB, H)

    # Attend Linear + sigmoid -> per-channel gates.
    z = jnp.dot(e, wa_ref[...], preferred_element_type=jnp.float32) + ba_ref[...]
    att = jax.nn.sigmoid(z)                                        # (BB, C) f32

    att_ref[...] = att[:, None, :]                                 # (BB, 1, C)

    # Excitation: gate x along dim 1 (node_axis=1).  Re-read the still-resident
    # VMEM tile; multiply in f32, cast to the output dtype on the store.
    out_ref[...] = (x_ref[...].astype(jnp.float32)
                    * att[:, :, None]).astype(out_ref.dtype)       # (BB, C, Np)


def _pick_block_b(B, row_bytes):
    """Rows per batch block: roofline-sized tiles, v7x-safe, >=2 grid steps."""
    cap_rows = max(1, (12 << 20) // row_bytes)   # 4x block bytes < 64 MiB VMEM
    tgt_rows = max(1, (8 << 20) // row_bytes)    # ~8 MiB x block target
    bb = min(cap_rows, tgt_rows)
    if bb >= B:
        # Small batch: keep >=2 grid steps so the "parallel" axis can shard
        # across v7x's two TensorCores (no effect on single-TC v5e/v6e).
        return B if B <= 1 else -(-B // 2)
    if bb >= 8:
        bb = (bb // 8) * 8                       # sublane-friendly DMA rows
    return max(1, bb)


def module_sero(x, we, be, bn_gamma, bn_beta, bn_mean, bn_var, wa, ba,
                *, eps=1e-5, block_b=None):
    """ModuleSERO forward (eval mode).

    x: (B, hidden_dim, N) float32 or bfloat16.
    we/be: embed Linear  (H', hidden_dim), (H',).
    bn_*:  BatchNorm1d(H') gamma/beta/running_mean/running_var.
    wa/ba: attend Linear (input_dim, H'), (input_dim,)  with input_dim == hidden_dim.
    Returns (x * att[..., None]  [x.dtype],  att  [float32]).
    """
    x = jnp.asarray(x)
    B, C, N = x.shape
    Hp = we.shape[0]
    A = wa.shape[0]
    assert A == C, "SFAF-GCN SERO broadcasting requires input_dim == hidden_dim"

    # --- one-time constant folding (wrapper side, free at runtime) ------------
    k = jnp.asarray(bn_gamma, jnp.float32) / jnp.sqrt(jnp.asarray(bn_var, jnp.float32) + eps)
    # fold 1/N of the readout mean AND the BN scale into the embed weight:
    we_eff = (jnp.asarray(we, jnp.float32).T * k[None, :]) * (1.0 / N)          # (C, H')
    be_eff = (jnp.asarray(be, jnp.float32) * k
              + (jnp.asarray(bn_beta, jnp.float32)
                 - jnp.asarray(bn_mean, jnp.float32) * k)).reshape(1, Hp)       # (1, H')
    wa_t = jnp.asarray(wa, jnp.float32).T                                       # (H', C)
    ba2 = jnp.asarray(ba, jnp.float32).reshape(1, A)                            # (1, C)

    # --- lane-dense node axis (only pads when N % 128 != 0) -------------------
    Np = ((N + 127) // 128) * 128
    x_in = x if Np == N else jnp.pad(x, ((0, 0), (0, 0), (0, Np - N)))
    # (zero columns add 0 to the readout sum; 1/N above uses the real N)

    # --- batch tiling ---------------------------------------------------------
    itemsize = jnp.dtype(x.dtype).itemsize
    row_bytes = C * Np * itemsize
    BB = block_b if block_b is not None else _pick_block_b(B, row_bytes)
    BB = max(1, min(BB, B))
    nblk = pl.cdiv(B, BB)            # ragged trailing block handled by Pallas

    out_dtype = x.dtype
    xb = BB * row_bytes
    ob = BB * C * Np * jnp.dtype(out_dtype).itemsize
    wb = 4 * (C * Hp + Hp + Hp * A + A)
    vmem_limit = int(min(max(2 * (xb + ob) + 2 * (wb + BB * A * 4) + (4 << 20),
                             32 << 20), 56 << 20))

    out, att3 = pl.pallas_call(
        sero_kernel,
        out_shape=(
            jax.ShapeDtypeStruct((B, C, Np), out_dtype),
            jax.ShapeDtypeStruct((B, 1, A), jnp.float32),
        ),
        grid=(nblk,),
        in_specs=[
            pl.BlockSpec((BB, C, Np), lambda b: (b, 0, 0)),   # x block (BB rows)
            pl.BlockSpec((C, Hp), lambda b: (0, 0)),          # embed W^T (mean+BN folded)
            pl.BlockSpec((1, Hp), lambda b: (0, 0)),          # embed bias (BN folded)
            pl.BlockSpec((Hp, A), lambda b: (0, 0)),          # attend W^T
            pl.BlockSpec((1, A), lambda b: (0, 0)),           # attend bias
        ],
        out_specs=(
            pl.BlockSpec((BB, C, Np), lambda b: (b, 0, 0)),
            pl.BlockSpec((BB, 1, A), lambda b: (b, 0, 0)),    # last 2 dims full-extent
        ),
        compiler_params=pltpu.CompilerParams(
            dimension_semantics=("parallel",),
            vmem_limit_bytes=vmem_limit),
    )(x_in, we_eff, be_eff, wa_t, ba2)

    if Np != N:
        out = out[:, :, :N]
    att = att3.reshape(B, A)
    return out, att


def sero_reference(x, we, be, bn_gamma, bn_beta, bn_mean, bn_var, wa, ba, eps=1e-5):
    """Pure-JAX mirror of the PyTorch forward (eval mode, node_axis=1)."""
    xf = x.astype(jnp.float32)
    r = xf.mean(axis=-1)                                          # x.mean(dim=-1)
    z = r @ we.T + be                                             # embed Linear
    z = (z - bn_mean) / jnp.sqrt(bn_var + eps) * bn_gamma + bn_beta  # BatchNorm1d (eval)
    e = jax.nn.gelu(z, approximate=False)                         # nn.GELU (exact)
    att = jax.nn.sigmoid(e @ wa.T + ba)                           # attend + sigmoid
    # node_axis=1 -> permute_idx == [0, 1] (identity); Dropout is identity in eval.
    out = xf * att[:, :, None]
    return out, att


if __name__ == "__main__":
    # batch=2, hidden_dim = input_dim = 32, nodes = 128 (lane-dense last axis).
    B, C, N = 2, 32, 128
    Hp = C                       # upscale=1 -> round(upscale*hidden_dim) = 32

    key = jax.random.PRNGKey(0)
    ks = jax.random.split(key, 9)
    x = jax.random.normal(ks[0], (B, C, N), dtype=jnp.float32)

    bound_e = 1.0 / np.sqrt(C)
    we = jax.random.uniform(ks[1], (Hp, C), jnp.float32, -bound_e, bound_e)
    be = jax.random.uniform(ks[2], (Hp,), jnp.float32, -bound_e, bound_e)
    bn_gamma = jax.random.uniform(ks[3], (Hp,), jnp.float32, 0.8, 1.2)
    bn_beta = 0.1 * jax.random.normal(ks[4], (Hp,), jnp.float32)
    bn_mean = 0.1 * jax.random.normal(ks[5], (Hp,), jnp.float32)
    bn_var = jax.random.uniform(ks[6], (Hp,), jnp.float32, 0.5, 1.5)

    bound_a = 1.0 / np.sqrt(Hp)
    wa = jax.random.uniform(ks[7], (C, Hp), jnp.float32, -bound_a, bound_a)
    ba = jax.random.uniform(ks[8], (C,), jnp.float32, -bound_a, bound_a)

    # --- float32 path ---------------------------------------------------------
    out, att = module_sero(x, we, be, bn_gamma, bn_beta, bn_mean, bn_var, wa, ba)
    jax.block_until_ready((out, att))

    ref_out, ref_att = sero_reference(x, we, be, bn_gamma, bn_beta, bn_mean, bn_var, wa, ba)
    np.testing.assert_allclose(np.asarray(att), np.asarray(ref_att), rtol=1e-5, atol=1e-5)
    np.testing.assert_allclose(np.asarray(out), np.asarray(ref_out), rtol=1e-5, atol=1e-5)

    # --- bfloat16 I/O path (halved HBM traffic; looser tolerances) ------------
    xb16 = x.astype(jnp.bfloat16)
    out16, att16 = module_sero(xb16, we, be, bn_gamma, bn_beta, bn_mean, bn_var, wa, ba)
    jax.block_until_ready((out16, att16))
    assert out16.dtype == jnp.bfloat16
    ref_out16, ref_att16 = sero_reference(xb16, we, be, bn_gamma, bn_beta,
                                          bn_mean, bn_var, wa, ba)
    np.testing.assert_allclose(np.asarray(att16), np.asarray(ref_att16),
                               rtol=1e-4, atol=1e-4)
    np.testing.assert_allclose(np.asarray(out16, dtype=np.float32),
                               np.asarray(ref_out16), rtol=2e-2, atol=2e-2)

    print("KERNEL_OK")
</pallas_src>

<mosaic_0001>
module attributes {stable_mosaic.version = 11 : i64} {
  func.func @sero_kernel(%arg0: i32, %arg1: memref<1x32x128xf32, #tpu.memory_space<vmem>>, %arg2: memref<32x32xf32, #tpu.memory_space<vmem>>, %arg3: memref<1x32xf32, #tpu.memory_space<vmem>>, %arg4: memref<32x32xf32, #tpu.memory_space<vmem>>, %arg5: memref<1x32xf32, #tpu.memory_space<vmem>>, %arg6: memref<1x32x128xf32, #tpu.memory_space<vmem>>, %arg7: memref<1x1x32xf32, #tpu.memory_space<vmem>>) attributes {dimension_semantics = [#tpu.dimension_semantics<parallel>], iteration_bounds = array<i64: 2>, scalar_prefetch = 0 : i64, scratch_operands = 0 : i64, tpu.core_type = #tpu.core_type<tc>, window_params = [{transform_indices = @transform_0, window_bounds = array<i64: 1, 32, 128>}, {pipeline_mode = #tpu.pipeline_mode<synchronous>, transform_indices = @transform_1, window_bounds = array<i64: 32, 32>}, {pipeline_mode = #tpu.pipeline_mode<synchronous>, transform_indices = @transform_2, window_bounds = array<i64: 1, 32>}, {pipeline_mode = #tpu.pipeline_mode<synchronous>, transform_indices = @transform_3, window_bounds = array<i64: 32, 32>}, {pipeline_mode = #tpu.pipeline_mode<synchronous>, transform_indices = @transform_4, window_bounds = array<i64: 1, 32>}, {transform_indices = @transform_5, window_bounds = array<i64: 1, 32, 128>}, {transform_indices = @transform_6, window_bounds = array<i64: 1, 1, 32>}]} {
    %c0 = arith.constant 0 : index
    %c0_0 = arith.constant 0 : index
    %c0_1 = arith.constant 0 : index
    %0 = vector.load %arg1[%c0, %c0_0, %c0_1] : memref<1x32x128xf32, #tpu.memory_space<vmem>>, vector<1x32x128xf32>
    %cst = arith.constant dense<0.000000e+00> : vector<1x32xf32>
    %1 = vector.multi_reduction <add>, %0, %cst [2] : vector<1x32x128xf32> to vector<1x32xf32>
    %c0_2 = arith.constant 0 : index
    %c0_3 = arith.constant 0 : index
    %2 = vector.load %arg2[%c0_2, %c0_3] : memref<32x32xf32, #tpu.memory_space<vmem>>, vector<32x32xf32>
    %cst_4 = arith.constant dense<0.000000e+00> : vector<1x32xf32>
    %3 = tpu.matmul %1, %2, %cst_4 {dimension_numbers = #tpu.dot_dimension_numbers<[1], [0], [0], [1], [0, 0, 1, 1], [], []>} : vector<1x32xf32>, vector<32x32xf32>, vector<1x32xf32> -> vector<1x32xf32>
    %c0_5 = arith.constant 0 : index
    %c0_6 = arith.constant 0 : index
    %4 = vector.load %arg3[%c0_5, %c0_6] : memref<1x32xf32, #tpu.memory_space<vmem>>, vector<1x32xf32>
    %5 = arith.addf %3, %4 : vector<1x32xf32>
    %cst_7 = arith.constant 5.000000e-01 : f32
    %6 = vector.broadcast %cst_7 : f32 to vector<1x32xf32>
    %7 = arith.mulf %6, %5 : vector<1x32xf32>
    %cst_8 = arith.constant 0.707106769 : f32
    %8 = vector.broadcast %cst_8 : f32 to vector<1x32xf32>
    %9 = arith.mulf %5, %8 : vector<1x32xf32>
    %10 = math.absf %9 : vector<1x32xf32>
    %cst_9 = arith.constant 0.327591091 : f32
    %11 = vector.broadcast %cst_9 : f32 to vector<1x32xf32>
    %12 = arith.mulf %11, %10 : vector<1x32xf32>
    %cst_10 = arith.constant 1.000000e+00 : f32
    %13 = vector.broadcast %cst_10 : f32 to vector<1x32xf32>
    %14 = arith.addf %13, %12 : vector<1x32xf32>
    %cst_11 = arith.constant 1.000000e+00 : f32
    %15 = vector.broadcast %cst_11 : f32 to vector<1x32xf32>
    %16 = arith.divf %15, %14 : vector<1x32xf32>
    %cst_12 = arith.constant 1.06140542 : f32
    %17 = vector.broadcast %cst_12 : f32 to vector<1x32xf32>
    %18 = arith.mulf %17, %16 : vector<1x32xf32>
    %cst_13 = arith.constant -1.45315206 : f32
    %19 = vector.broadcast %cst_13 : f32 to vector<1x32xf32>
    %20 = arith.addf %18, %19 : vector<1x32xf32>
    %21 = arith.mulf %20, %16 : vector<1x32xf32>
    %cst_14 = arith.constant 1.42141378 : f32
    %22 = vector.broadcast %cst_14 : f32 to vector<1x32xf32>
    %23 = arith.addf %21, %22 : vector<1x32xf32>
    %24 = arith.mulf %23, %16 : vector<1x32xf32>
    %cst_15 = arith.constant -0.284496725 : f32
    %25 = vector.broadcast %cst_15 : f32 to vector<1x32xf32>
    %26 = arith.addf %24, %25 : vector<1x32xf32>
    %27 = arith.mulf %26, %16 : vector<1x32xf32>
    %cst_16 = arith.constant 0.254829586 : f32
    %28 = vector.broadcast %cst_16 : f32 to vector<1x32xf32>
    %29 = arith.addf %27, %28 : vector<1x32xf32>
    %30 = arith.mulf %29, %16 : vector<1x32xf32>
    %cst_17 = arith.constant 0.000000e+00 : f32
    %31 = vector.broadcast %cst_17 : f32 to vector<1x32xf32>
    %32 = arith.subf %31, %10 : vector<1x32xf32>
    %33 = arith.mulf %32, %10 : vector<1x32xf32>
    %34 = math.exp %33 : vector<1x32xf32>
    %35 = arith.mulf %30, %34 : vector<1x32xf32>
    %cst_18 = arith.constant 1.000000e+00 : f32
    %36 = vector.broadcast %cst_18 : f32 to vector<1x32xf32>
    %37 = arith.subf %36, %35 : vector<1x32xf32>
    %cst_19 = arith.constant 0.000000e+00 : f32
    %38 = vector.broadcast %cst_19 : f32 to vector<1x32xf32>
    %39 = arith.cmpf olt, %9, %38 : vector<1x32xf32>
    %cst_20 = arith.constant 0.000000e+00 : f32
    %40 = vector.broadcast %cst_20 : f32 to vector<1x32xf32>
    %41 = arith.subf %40, %37 : vector<1x32xf32>
    %42 = arith.select %39, %41, %37 : vector<1x32xi1>, vector<1x32xf32>
    %cst_21 = arith.constant 1.000000e+00 : f32
    %43 = vector.broadcast %cst_21 : f32 to vector<1x32xf32>
    %44 = arith.addf %43, %42 : vector<1x32xf32>
    %45 = arith.mulf %7, %44 : vector<1x32xf32>
    %c0_22 = arith.constant 0 : index
    %c0_23 = arith.constant 0 : index
    %46 = vector.load %arg4[%c0_22, %c0_23] : memref<32x32xf32, #tpu.memory_space<vmem>>, vector<32x32xf32>
    %cst_24 = arith.constant dense<0.000000e+00> : vector<1x32xf32>
    %47 = tpu.matmul %45, %46, %cst_24 {dimension_numbers = #tpu.dot_dimension_numbers<[1], [0], [0], [1], [0, 0, 1, 1], [], []>} : vector<1x32xf32>, vector<32x32xf32>, vector<1x32xf32> -> vector<1x32xf32>
    %c0_25 = arith.constant 0 : index
    %c0_26 = arith.constant 0 : index
    %48 = vector.load %arg5[%c0_25, %c0_26] : memref<1x32xf32, #tpu.memory_space<vmem>>, vector<1x32xf32>
    %49 = arith.addf %47, %48 : vector<1x32xf32>
    %50 = arith.negf %49 : vector<1x32xf32>
    %51 = math.exp %50 : vector<1x32xf32>
    %cst_27 = arith.constant 1.000000e+00 : f32
    %52 = vector.broadcast %cst_27 : f32 to vector<1x32xf32>
    %53 = arith.addf %52, %51 : vector<1x32xf32>
    %54 = arith.divf %52, %53 : vector<1x32xf32>
    %55 = vector.shape_cast %54 : vector<1x32xf32> to vector<1x1x32xf32>
    %c0_28 = arith.constant 0 : index
    %c0_29 = arith.constant 0 : index
    %c0_30 = arith.constant 0 : index
    %56 = vector.load %arg7[%c0_28, %c0_29, %c0_30] : memref<1x1x32xf32, #tpu.memory_space<vmem>>, vector<1x1x32xf32>
    tpu.vector_store %arg7[%c0_28, %c0_29, %c0_30], %55 {strides = array<i32>} : memref<1x1x32xf32, #tpu.memory_space<vmem>>, vector<1x1x32xf32>,
    %c0_31 = arith.constant 0 : index
    %c0_32 = arith.constant 0 : index
    %c0_33 = arith.constant 0 : index
    %57 = vector.load %arg1[%c0_31, %c0_32, %c0_33] : memref<1x32x128xf32, #tpu.memory_space<vmem>>, vector<1x32x128xf32>
    %58 = vector.shape_cast %54 : vector<1x32xf32> to vector<1x32x1xf32>
    %59 = vector.broadcast %58 : vector<1x32x1xf32> to vector<1x32x128xf32>
    %60 = arith.mulf %57, %59 : vector<1x32x128xf32>
    %c0_34 = arith.constant 0 : index
    %c0_35 = arith.constant 0 : index
    %c0_36 = arith.constant 0 : index
    %61 = vector.load %arg6[%c0_34, %c0_35, %c0_36] : memref<1x32x128xf32, #tpu.memory_space<vmem>>, vector<1x32x128xf32>
    tpu.vector_store %arg6[%c0_34, %c0_35, %c0_36], %60 {strides = array<i32>} : memref<1x32x128xf32, #tpu.memory_space<vmem>>, vector<1x32x128xf32>,
    return
  }
  func.func @transform_0(%arg0: i32) -> (i32, i32, i32) {
    %c0_i32 = arith.constant 0 : i32
    %c0_i32_0 = arith.constant 0 : i32
    %c0_i32_1 = arith.constant 0 : i32
    return %arg0, %c0_i32, %c0_i32_0 : i32, i32, i32
  }
  func.func @transform_1(%arg0: i32) -> (i32, i32) {
    %c0_i32 = arith.constant 0 : i32
    %c0_i32_0 = arith.constant 0 : i32
    %c0_i32_1 = arith.constant 0 : i32
    return %c0_i32, %c0_i32_0 : i32, i32
  }
  func.func @transform_2(%arg0: i32) -> (i32, i32) {
    %c0_i32 = arith.constant 0 : i32
    %c0_i32_0 = arith.constant 0 : i32
    %c0_i32_1 = arith.constant 0 : i32
    return %c0_i32, %c0_i32_0 : i32, i32
  }
  func.func @transform_3(%arg0: i32) -> (i32, i32) {
    %c0_i32 = arith.constant 0 : i32
    %c0_i32_0 = arith.constant 0 : i32
    %c0_i32_1 = arith.constant 0 : i32
    return %c0_i32, %c0_i32_0 : i32, i32
  }
  func.func @transform_4(%arg0: i32) -> (i32, i32) {
    %c0_i32 = arith.constant 0 : i32
    %c0_i32_0 = arith.constant 0 : i32
    %c0_i32_1 = arith.constant 0 : i32
    return %c0_i32, %c0_i32_0 : i32, i32
  }
  func.func @transform_5(%arg0: i32) -> (i32, i32, i32) {
    %c0_i32 = arith.constant 0 : i32
    %c0_i32_0 = arith.constant 0 : i32
    %c0_i32_1 = arith.constant 0 : i32
    return %arg0, %c0_i32, %c0_i32_0 : i32, i32, i32
  }
  func.func @transform_6(%arg0: i32) -> (i32, i32, i32) {
    %c0_i32 = arith.constant 0 : i32
    %c0_i32_0 = arith.constant 0 : i32
    %c0_i32_1 = arith.constant 0 : i32
    return %arg0, %c0_i32, %c0_i32_0 : i32, i32, i32
  }
}

</mosaic_0001>

<bundles_post_ra>
// kernel: tpu_custom_call.1
= control target key start
LH: loop header
LB: loop body
LE: loop exit
PB: predicated region body
PF: predicated region fallthrough
CT: control target
= control target key end

     0   :  { %12 = vsyncpa [#allocation3], 0  ;;  %s1199_s0 = inlined_call_operand.hbm [shape: f32[2,32,128], index: 0, kind: input, shape index: {}]   ;;  %s1200_s1 = inlined_call_operand.hbm [shape: f32[32,32], index: 1, kind: input, shape index: {}]   ;;  %s1201_s2 = inlined_call_operand.vmem [shape: f32[1,32], index: 2, kind: input, shape index: {}]   ;;  %s1202_s3 = inlined_call_operand.hbm [shape: f32[32,32], index: 3, kind: input, shape index: {}]   ;;  %s1203_s4 = inlined_call_operand.vmem [shape: f32[1,32], index: 4, kind: input, shape index: {}]   ;;  %s1204_s5 = inlined_call_operand.hbm [shape: f32[2,32,128], index: 5, kind: output, shape index: {0}]   ;;  %s1205_s6 = inlined_call_operand.hbm [shape: f32[2,1,32], index: 6, kind: output, shape index: {1}]  }
   0x1   :  { %14 = vsyncpa [#allocation3 + $0x1], 0 }
   0x2   :  { %15 = vsyncpa [#allocation6], 0 }
   0x3   :  { %16 = vsyncpa [#allocation4], 0 }
   0x4   :  { %18 = vsyncpa [#allocation4 + $0x1], 0 }
   0x5   :  { %19 = vsyncpa [#allocation10], 0 }
   0x6   :  { %21 = vsyncpa [#allocation10 + $0x1], 0  ;;  %s1000_s21 = smov 0   ;;  %s1002_s22 = smov 0  }
   0x7   :  { %s1004_s23 = smov 0   ;;  %s1006_s24 = smov 0  }
   0x8 LB: > { %s1021_s25 = sadd.s32 4294967295, %s957_s24   ;;  %s653_s26 = sadd.s32 4294967294, %s957_s24   ;;  %s957_s24 = sphi %s1006_s24, %s1219_s24   ;;  %s953_s23 = sphi %s1004_s23, %s1218_s23   ;;  %s949_s22 = sphi %s1002_s22, %s1217_s22   ;;  %s945_s21 = sphi %s1000_s21, %s1216_s21  }
   0x9   : > { %p47_p0 = scmp.ne.s32.totalorder %s949_s22, %s945_s21  ;;  %p48_p1 = scmp.eq.s32.totalorder %s1021_s25, 0 }
   0xa   : > { %p155_p2 = scmp.eq.s32.totalorder %s1021_s25, 1  ;;  %p161_p3 = scmp.eq.s32.totalorder %s653_s26, 1 }
   0xb   : > { %p1030_p4 = por %p48_p1, %p47_p0  ;;  %p654_p5 = scmp.ge.s32.totalorder %s957_s24, 1 }
   0xc   : > { %p1035_p6 = por %p161_p3, %p47_p0  ;;  %p194_p7 = scmp.lt.s32.totalorder %s957_s24, 3 }
   0xd   : > { %s205_s7 = sshll.u32 %s1200_s1, 4  ;;  %s959_s9 = smov [#allocation5]   ;;  %s206_s7 = int_to_ptr.hbm [resolvable:$true] %s205_s7 }
   0xe   : > { %p1043_p8 = pnand %p654_p5, %p194_p7  ;;  %s207_s10 = sshll.u32 %s959_s9, 4  ;;  %s208_s10 = int_to_ptr.vmem [resolvable:$true] %s207_s10 }
   0xf   : > { %s222_s13 = sshll.u32 %s1202_s3, 4  ;;  %s1206_s14 = smov 128   ;;  %s223_s13 = int_to_ptr.hbm [resolvable:$true] %s222_s13 }
  0x10   : > { %p690_p9 = pneg %p1043_p8  ;;  %s1207_s15 = smov 8  }
  0x11   : > { %s962_s16 = smov [#allocation7]   ;;  %s1062_s18 = sadd.s32 1, %s957_s24  }
  0x12   : > { %p691_p10 = pnand %p690_p9, %p48_p1  ;;  %s224_s17 = sshll.u32 %s962_s16, 4  ;;  %s225_s17 = int_to_ptr.vmem [resolvable:$true] %s224_s17 }
  0x13   : > { %s34_s19 = sadd.s32 1, %s953_s23  ;;  %s31_s20 = ssub.s32 %s957_s24, %s1062_s18 }
  0x14   : > { %693 = dma.hbm_to_vmem [thread:$0]  (!%p691_p10), %s206_s7, 512, %s208_s10, [#allocation6], %s1206_s14, %s1206_s14, %s1207_s15  }
  0x15   : > { %696 = dma.hbm_to_vmem [thread:$0]  (!%p691_p10), %s223_s13, 512, %s225_s17, [#allocation6], %s1206_s14, %s1206_s14, %s1207_s15  }
  0x16   : > { %p41_p12 = scmp.ne.s32.totalorder %s953_s23, %s949_s22  ;;  %p32_p13 = scmp.eq.s32.totalorder %s31_s20, 0 }
  0x17   : > { %p42_p0 = scmp.eq.s32.totalorder %s957_s24, 0  ;;  %p710_p5 = scmp.lt.s32.totalorder %s957_s24, 2 }
  0x18   : > { %p1072_p3 = por %p155_p2, %p41_p12  ;;  %s241_s30 = sand.u32 1, %s953_s23  }
  0x19   : > { %s1078_s29 = scalar_select %p32_p13, %s953_s23, %s34_s19  }
  0x1a   : > { %p43_p7 = por %p42_p0, %p41_p12  ;;  %s658_s7 = sshll.u32 %s241_s30, 5 }
  0x1b   : > { %s674_s9 = sshll.u32 %s957_s24, 5  ;;  %s245_s13 = scalar_lea.vmem [#allocation2], %s658_s7 }
  0x1c   : > { %s250_s12 = scalar_lea.hbm %s1199_s0, %s674_s9  ;;  %s253_s16 = sshll.u32 %s245_s13, 4  ;;  %s254_s16 = int_to_ptr.vmem [resolvable:$true] %s253_s16 }
  0x1d   : > { %s251_s17 = sshll.u32 %s250_s12, 4  ;;  %p1085_p2 = pnand %p710_p5, %p43_p7  ;;  %s252_s17 = int_to_ptr.hbm [resolvable:$true] %s251_s17 }
  0x1e   : > { %s242_s19 = scalar_lea.sflag [#allocation3], %s241_s30  ;;  %s825_s14 = sshra.s32 %s252_s17, 4  ;;  %s826_s14 = int_to_ptr.hbm [resolvable:$true] %s825_s14 }
  0x1f   : > { %s827_s15 = scalar_lea.hbm %s826_s14, 32  ;;  %p829_p10 = pneg %p1085_p2 }
  0x20   : > { %p828_p9 = scmp.ne.s32.totalorder %s826_s14, %s827_s15  ;;  %s832_s10 = scalar_lea.hbm %s1199_s0, 64 }
  0x21   : > { %p833_p0 = scmp.lt.s32.totalorder %s826_s14, %s1199_s0  ;;  %p834_p5 = scmp.lt.s32.totalorder %s832_s10, %s827_s15 }
  0x22   : > { %p830_p12 = pnand %p829_p10, %p828_p9 }
  0x23   : > { %p835_p7 = por %p834_p5, %p833_p0 }
  0x24   : > { %p831_p13 = pneg %p830_p12 }
  0x26   : > { %p836_p11 = pnand %p835_p7, %p831_p13 }
  0x28   : > { %839 = shalt.err (!%p836_p11)
}
  0x29   : > { %s1213_s30 = smov 8   ;;  %s1214_s13 = smov 128  }
  0x2a   : > { %700 = dma.hbm_to_vmem [thread:$0]  (!%p1085_p2), %s252_s17, 512, %s254_s16, %s242_s19, %s1214_s13, %s1214_s13, %s1213_s30  }
  0x2b   : > { %265 = sbr.rel (%p1043_p8) target bundleno = 643 (0x283), region = 40  ;;  %s1105_s9 = sand.u32 (!%p1043_p8), 1, %s949_s22  }
  0x2c   : > { %s662_s14 = sshll.u32 (!%p1043_p8), %s1105_s9, 5  ;;  %s268_s15 = scalar_lea.sflag (!%p1043_p8), [#allocation3], %s1105_s9 }
  0x2d   : > { %s271_s7 = scalar_lea.vmem (!%p1043_p8), [#allocation2], %s662_s14 }
  0x30   : > { %928 = dma.done.wait (%p1030_p4), %s268_s15, 512  }
  0x31   : > { %930 = vsyncadd (%p1030_p4), %s268_s15, 4294966784 }
  0x32   : > { %932 = dma.done.wait (%p48_p1), [#allocation6], 1024  }
  0x33   : > { %934 = vsyncadd (%p48_p1), [#allocation6], 4294966272  ;;  %v1119_v0 = vld [vmem:[%s271_s7] sm:$0xff]  ;;  %v1121_v1 = vld [vmem:[%s271_s7 + $0x10] sm:$0xff]  ;;  %v336_v8 = vlaneseq  ;;  %vm341_vm0 = vcmask 130112   ;;  %vm345_vm1 = vcmask 195712   ;;  %s531_s10 = scalar_lea.hbm %s1205_s6, %s1021_s25 }
  0x34   : > { %319 = vadd.xlane.f32.xlu0 %v1119_v0  ;;  %323 = vadd.xlane.f32.xlu1 %v1121_v1  ;;  %v1125_v2 = vld [vmem:[%s271_s7 + $0x8] sm:$0xff]  ;;  %v1127_v3 = vld [vmem:[%s271_s7 + $0x18] sm:$0xff]  ;;  %v329_v5 = vld [vmem:[#allocation5 + $0x10] sm:$0xff]  ;;  %vm349_vm2 = vcmask 261312   ;;  %vm351_vm3 = vcmask 261120   ;;  %s314_s11 = scalar_lea.vmem [#allocation9], %s1105_s9 }
  0x35   : > { %v330_v4 = vld [vmem:[#allocation5 + $0x18] sm:$0xff]  ;;  %v328_v6 = vld [vmem:[#allocation5 + $0x8] sm:$0xff]  ;;  %v327_v7 = vld [vmem:[#allocation5] sm:$0xff]  ;;  %v337_v11 = vand.u32 127, %v336_v8  ;;  %s1146_s12 = sshll.u32 %s314_s11, 4  ;;  %s535_s30 = sshll.u32 %s531_s10, 4  ;;  %s534_s12 = int_to_ptr.vmem [resolvable:$true] %s1146_s12  ;;  %s536_s30 = int_to_ptr.hbm [resolvable:$true] %s535_s30 }
  0x36   : > { %366 = vmatpush.msra.mxu0 %v330_v4  ;;  %v417_v24 = vld [vmem:[#allocation7 + $0x18] sm:$0xff]  ;;  %v416_v25 = vld [vmem:[#allocation7 + $0x10] sm:$0xff]  ;;  %v415_v26 = vld [vmem:[#allocation7 + $0x8] sm:$0xff]  ;;  %vm461_vm12 = vcmask 253952   ;;  %s506_s13 = scalar_lea.sflag [#allocation10], %s1105_s9  ;;  %s869_s15 = sshra.s32 %s536_s30, 4  ;;  %s870_s15 = int_to_ptr.hbm [resolvable:$true] %s869_s15 }
  0x37   : > { %v339_v12 = vadd.s32 4294967288, %v337_v11  ;;  %v347_v13 = vadd.s32 4294967272, %v337_v11  ;;  %v343_v14 = vadd.s32 4294967280, %v337_v11  ;;  %434 = vmatpush.msra.mxu1 %v417_v24  ;;  %v414_v27 = vld [vmem:[#allocation7] sm:$0xff]  ;;  %s871_s7 = scalar_lea.hbm %s870_s15, 1  ;;  %s875_s16 = scalar_lea.hbm %s1205_s6, 2 }
  0x38   : > { %367 = vmatpush.msra.mxu0 %v329_v5  ;;  %v331_v28 = vld [vmem:[%s1201_s2] sm:$0x1]  ;;  %v469_v5 = vshrl.u32 %v336_v8, 7  ;;  %p872_p1 = scmp.ne.s32.totalorder %s870_s15, %s871_s7  ;;  %p876_p11 = scmp.lt.s32.totalorder %s870_s15, %s1205_s6 }
  0x39   : > { %435 = vmatpush.msra.mxu1 %v416_v25  ;;  %p877_p2 = scmp.lt.s32.totalorder %s875_s16, %s871_s7 }
  0x3a   : > { %368 = vmatpush.msra.mxu0 %v328_v6  ;;  %752 = vset.pattern.permute.xlu2 %v469_v5  ;;  %v488_v6 = vadd.s32 24, %v469_v5  ;;  %p873_p4 = pnand %p872_p1, %p1072_p3 }
  0x3b   : > { %436 = vmatpush.msra.mxu1 %v415_v26  ;;  %p878_p9 = por %p877_p2, %p876_p11 }
  0x3c   : > { %321 = vadd.xlane.f32.xlu0 %v1125_v2  ;;  %325 = vadd.xlane.f32.xlu1 %v1127_v3  ;;  %p874_p8 = pneg %p873_p4 }
  0x3d   : > { %369 = vmatpush.msra.mxu0 %v327_v7  ;;  %437 = vmatpush.msra.mxu1 %v414_v27  ;;  %v482_v7 = vadd.s32 16, %v469_v5 }
  0x3e   : > { %755 = vset.pattern.permute.xlu1 %v488_v6  ;;  %p879_p10 = pnand %p878_p9, %p874_p8 }
  0x3f   : > { %754 = vset.pattern.permute.xlu0 %v482_v7 }
  0xa7   : > { %v320_v9 = vpop.xlane.xlu0 %319  ;;  %v324_v10 = vpop.xlane.xlu1 %323 }
  0xa8   : > { %v338_v17 = vperm.slane %v320_v9, %v337_v11  ;;  %v344_v20 = vperm.slane %v324_v10, %v343_v14  ;;  %v418_v9 = vld [vmem:[%s1203_s4] sm:$0x1] }
  0xaf   : > { %v322_v15 = vpop.xlane.xlu0 %321  ;;  %v326_v16 = vpop.xlane.xlu1 %325 }
  0xb0   : > { %v340_v18 = vperm.slane %v322_v15, %v339_v12  ;;  %v348_v19 = vperm.slane %v326_v16, %v347_v13 }
  0xb2   : > { %v342_v21 = vsel %vm341_vm0, %v340_v18, %v338_v17 }
  0xb3   : > { %v346_v22 = vsel %vm345_vm1, %v344_v20, %v342_v21 }
  0xb4   : > { %v350_v23 = vsel %vm349_vm2, %v348_v19, %v346_v22 }
  0xb5   : > { %666 = vmatmul.msk.f32.vlgmr.msra.gmra.mxu0 %vm351_vm3, %v350_v23 }
 0x132   : > { %v371_v29 = vpop.f32.mrf.mxu0 }
 0x133   : > { %v372_v30 = vadd.f32 %v371_v29, %v331_v28 }
 0x135   : > { %v375_v31 = vmul.f32 0.70710677, %v372_v30  ;;  %v374_v62 = vmul.f32 0.5, %v372_v30 }
 0x137   : > { %v376_v32 = vand.u32 2147483647, %v375_v31  ;;  %vm409_vm8 = vcmp.lt.f32.partialorder %v375_v31, 0.0 }
 0x139   : > { %v377_v33 = vmul.f32 0.3275911, %v376_v32  ;;  %v403_v44 = vsub.f32 0.0, %v376_v32 }
 0x13b   : > { %v378_v34 = vadd.f32 1.0, %v377_v33  ;;  %v404_v48 = vmul.f32 %v403_v44, %v376_v32 }
 0x13d   : > { %757 = vrcp.f32 %v378_v34  ;;  %v390_v38 = vand.u32 2147483648, %v378_v34  ;;  %v388_v40 = vand.u32 2147483647, %v378_v34  ;;  %vm384_vm5 = vweird.f32 %v378_v34 }
 0x13e   : > { %v405_v51 = vmul.f32 1.442695, %v404_v48 }
 0x13f   : > { %v391_v42 = vor.u32 1.1754944e-38, %v390_v38  ;;  %vm389_vm7 = vcmp.eq.f32.partialorder %v388_v40, 8.507059e+37 }
 0x140   : > { %759 = vpow2.f32 %v405_v51 }
 0x143   : > { %v758_v35 = vpop.eup %757 }
 0x144   : > { %v380_v36 = vmul.f32 %v758_v35, %v378_v34  ;;  %vm385_vm4 = vweird.f32 %v758_v35 }
 0x145   : > { %vm386_vm6 = vmor %vm384_vm5, %vm385_vm4 }
 0x146   : > { %v381_v37 = vsub.f32 1.0, %v380_v36  ;;  %v760_v57 = vpop.eup %759 }
 0x148   : > { %v382_v39 = vmul.f32 %v758_v35, %v381_v37 }
 0x14a   : > { %v383_v41 = vadd.f32 %v758_v35, %v382_v39 }
 0x14c   : > { %v387_v43 = vsel %vm386_vm6, %v758_v35, %v383_v41 }
 0x14d   : > { %v392_v45 = vsel %vm389_vm7, %v391_v42, %v387_v43 }
 0x14e   : > { %v394_v46 = vmul.f32 1.0614054, %v392_v45 }
 0x150   : > { %v395_v47 = vadd.f32 -1.4531521, %v394_v46 }
 0x152   : > { %v396_v49 = vmul.f32 %v395_v47, %v392_v45 }
 0x154   : > { %v397_v50 = vadd.f32 1.4214138, %v396_v49 }
 0x156   : > { %v398_v52 = vmul.f32 %v397_v50, %v392_v45 }
 0x158   : > { %v399_v53 = vadd.f32 -0.28449672, %v398_v52 }
 0x15a   : > { %v400_v54 = vmul.f32 %v399_v53, %v392_v45 }
 0x15c   : > { %v401_v55 = vadd.f32 0.2548296, %v400_v54 }
 0x15e   : > { %v402_v56 = vmul.f32 %v401_v55, %v392_v45 }
 0x160   : > { %v407_v58 = vmul.f32 %v760_v57, %v402_v56 }
 0x162   : > { %v408_v59 = vsub.f32 1.0, %v407_v58 }
 0x164   : > { %v410_v60 = vsub.f32 0.0, %v408_v59 }
 0x166   : > { %v411_v61 = vsel %vm409_vm8, %v410_v60, %v408_v59 }
 0x167   : > { %v412_v63 = vadd.f32 1.0, %v411_v61 }
 0x169   : > { %v413_v4 = vmul.f32 %v412_v63, %v374_v62 }
 0x16b   : > { %667 = vmatmul.msk.f32.vlgmr.msra.gmra.mxu1 %vm351_vm3, %v413_v4 }
 0x1e8   : > { %v439_v10 = vpop.f32.mrf.mxu1 }
 0x1e9   : > { %v440_v11 = vadd.f32 %v439_v10, %v418_v9 }
 0x1eb   : > { %v668_v12 = vmul.f32 -1.442695, %v440_v11 }
 0x1ed   : > { %761 = vpow2.f32 %v668_v12 }
 0x1f3   : > { %v762_v13 = vpop.eup %761 }
 0x1f4   : > { %v445_v14 = vadd.f32 1.0, %v762_v13 }
 0x1f6   : > { %763 = vrcp.f32 %v445_v14  ;;  %v457_v17 = vand.u32 2147483648, %v445_v14  ;;  %v455_v19 = vand.u32 2147483647, %v445_v14  ;;  %vm451_vm10 = vweird.f32 %v445_v14 }
 0x1f8   : > { %v458_v21 = vor.u32 1.1754944e-38, %v457_v17  ;;  %vm456_vm13 = vcmp.eq.f32.partialorder %v455_v19, 8.507059e+37 }
 0x1fc   : > { %v764_v15 = vpop.eup %763 }
 0x1fd   : > { %v447_v8 = vmul.f32 %v764_v15, %v445_v14  ;;  %vm452_vm9 = vweird.f32 %v764_v15 }
 0x1fe   : > { %vm453_vm11 = vmor %vm451_vm10, %vm452_vm9 }
 0x1ff   : > { %v448_v16 = vsub.f32 1.0, %v447_v8 }
 0x201   : > { %v449_v18 = vmul.f32 %v764_v15, %v448_v16 }
 0x203   : > { %v450_v20 = vadd.f32 %v764_v15, %v449_v18 }
 0x205   : > { %v454_v22 = vsel %vm453_vm11, %v764_v15, %v450_v20 }
 0x206   : > { %v459_v23 = vsel %vm456_vm13, %v458_v21, %v454_v22 }
 0x207   : > { %v467_v24 = vperm.slane %v459_v23, 0  ;;  %462 = vst.msk [vmem:[%s314_s11] sm:$0x1] %vm461_vm12, %v459_v23 }
 0x208   : > { %882 = shalt.err (!%p879_p10)
}
 0x209   : > { %687 = dma.vmem_to_hbm [thread:$0]  (%p1072_p3), %s534_s12, 16, %s536_s30, %s506_s13   ;;  %490 = vperm.xlu1 %755, %v467_v24   ;;  %484 = vperm.xlu0 %754, %v467_v24   ;;  %v476_v25 = vadd.s32 8, %v469_v5 }
 0x20a   : > { %472 = vperm.xlu2 %752, %v467_v24   ;;  %s308_s19 = scalar_lea.vmem [#allocation8], %s662_s14  ;;  %s675_s10 = sshll.u32 %s1021_s25, 5 }
 0x20b   : > { %s516_s30 = scalar_lea.hbm %s1204_s5, %s675_s10  ;;  %s517_s13 = sshll.u32 %s308_s19, 4  ;;  %s518_s13 = int_to_ptr.vmem [resolvable:$true] %s517_s13 }
 0x20c   : > { %s519_s15 = sshll.u32 %s516_s30, 4  ;;  %s501_s25 = scalar_lea.sflag [#allocation4], %s1105_s9  ;;  %s520_s15 = int_to_ptr.hbm [resolvable:$true] %s519_s15 }
 0x20d   : > { %s897_s14 = sshra.s32 %s520_s15, 4  ;;  %s903_s16 = scalar_lea.hbm %s1204_s5, 64  ;;  %s898_s14 = int_to_ptr.hbm [resolvable:$true] %s897_s14 }
 0x20e   : > { %s899_s7 = scalar_lea.hbm %s898_s14, 32  ;;  %p904_p5 = scmp.lt.s32.totalorder %s898_s14, %s1204_s5 }
 0x20f   : > { %p900_p12 = scmp.ne.s32.totalorder %s898_s14, %s899_s7  ;;  %p905_p7 = scmp.lt.s32.totalorder %s903_s16, %s899_s7 }
 0x211   : > { %756 = vset.pattern.permute.xlu0 %v488_v6  ;;  %p901_p13 = pnand %p900_p12, %p1072_p3  ;;  %p906_p1 = por %p905_p7, %p904_p5 }
 0x212   : > { %753 = vset.pattern.permute.xlu2 %v476_v25 }
 0x213   : > { %p902_p0 = pneg %p901_p13 }
 0x215   : > { %p907_p4 = pnand %p906_p1, %p902_p0 }
 0x21a   : > { %478 = vperm.xlu2 %753, %v467_v24  }
 0x264   : > { %v473_v26 = vpop.permute.xlu2 %472 }
 0x265   : > { %v492_v27 = vmul.f32 %v473_v26, %v1119_v0 }
 0x267   : > { %496 = vst [vmem:[%s308_s19] sm:$0xff] %v492_v27 }
 0x274   : > { %v479_v28 = vpop.permute.xlu2 %478 }
 0x275   : > { %v493_v29 = vmul.f32 %v479_v28, %v1125_v2 }
 0x277   : > { %497 = vst [vmem:[%s308_s19 + $0x8] sm:$0xff] %v493_v29 }
 0x27b   : > { %v491_v30 = vpop.permute.xlu1 %490  ;;  %v485_v31 = vpop.permute.xlu0 %484 }
 0x27c   : > { %v495_v0 = vmul.f32 %v491_v30, %v1127_v3  ;;  %v494_v32 = vmul.f32 %v485_v31, %v1121_v1 }
 0x27e   : > { %499 = vst [vmem:[%s308_s19 + $0x18] sm:$0xff] %v495_v0 }
 0x27f   : > { %498 = vst [vmem:[%s308_s19 + $0x10] sm:$0xff] %v494_v32 }
 0x280   : > { %910 = shalt.err (!%p907_p4)
}
 0x281   : > { %s963_s9 = smov 128   ;;  %s964_s19 = smov 8  }
 0x282   : > { %686 = dma.vmem_to_hbm [thread:$0]  (%p1072_p3), %s518_s13, 512, %s520_s15, %s501_s25, %s963_s9, %s963_s9, %s964_s19  }
 0x283 PF: > { %s547_s10 = sand.u32 1, %s945_s21   ;;  %p1215_p8 = scmp.ge.s32.totalorder %s957_s24, 2 }
 0x284   : > { %s548_s11 = scalar_lea.sflag [#allocation4], %s547_s10 }
 0x285   : > { %p702_p11 = pnand %p1215_p8, %p1035_p6 }
 0x287   : > { %p703_p2 = pneg %p702_p11 }
 0x289   : > { %936 = dma.done.wait (%p703_p2), %s548_s11, 512  }
 0x28a   : > { %938 = vsyncadd (%p703_p2), %s548_s11, 4294966784  ;;  %s558_s12 = scalar_lea.sflag [#allocation10], %s547_s10 }
 0x28b   : > { %940 = dma.done.wait (%p703_p2), %s558_s12, 16  }
 0x28c   : > { %942 = vsyncadd (%p703_p2), %s558_s12, 4294967280  ;;  %p24_p3 = scmp.ge.s32.totalorder %s1062_s18, 4   ;;  %s1216_s21 = smov %s949_s22 }
 0x28d   : > { %s1217_s22 = smov %s953_s23  ;;  %s1218_s23 = smov %s1078_s29 }
 0x28e   : > { %s1219_s24 = smov %s1062_s18  ;;  %26 = sbr.rel (!%p24_p3) target bundleno = 8 (0x8), region = 110 }
 0x293   :  { %563 = vsyncpa [#allocation3], 1 }
 0x294   :  { %565 = vsyncpa [#allocation3 + $0x1], 1 }
 0x295   :  { %566 = vsyncpa [#allocation6], 1 }
 0x296   :  { %567 = vsyncpa [#allocation4], 1 }
 0x297   :  { %569 = vsyncpa [#allocation4 + $0x1], 1 }
 0x298   :  { %570 = vsyncpa [#allocation10], 1 }
 0x299   :  { %572 = vsyncpa [#allocation10 + $0x1], 1 }

</bundles_post_ra>
